<compile_context>
chip_gen: v5e
topology: v5e:2x2
jax: 0.10.0
libtpu: 0.0.40
codegen_flags: <defaults>
</compile_context>

<pallas_src>
import jax
import jax.numpy as jnp
from jax.experimental import pallas as pl
from jax.experimental.pallas import tpu as pltpu

NEG_SLOPE = 0.01   # PyTorch F.leaky_relu default
LANE = 128         # TPU lane width


def _round_up(x, m):
    return (x + m - 1) // m * m


def _leaky_relu(x):
    # max(x, a*x) == leaky_relu(x) for 0 < a < 1; 2 VALU ops (mul + max).
    return jnp.maximum(x, NEG_SLOPE * x)


def central_critic_kernel(x_ref, w1_ref, b1_ref, w2_ref, b2_ref,
                          w3_ref, b3_ref, q_ref):
    # fc1 + leaky_relu (MXU matmul, f32 accumulation; activation in f32).
    h = jnp.dot(x_ref[...], w1_ref[...], preferred_element_type=jnp.float32)
    h = _leaky_relu(h + b1_ref[...])
    # fc2 + leaky_relu
    h = jnp.dot(h.astype(w2_ref.dtype), w2_ref[...],
                preferred_element_type=jnp.float32)
    h = _leaky_relu(h + b2_ref[...])
    # fc3 (no activation), narrow output
    q = jnp.dot(h.astype(w3_ref.dtype), w3_ref[...],
                preferred_element_type=jnp.float32)
    q_ref[...] = (q + b3_ref[...]).astype(q_ref.dtype)


def central_critic(x, w1, b1, w2, b2, w3, b3, *, tile_b=None,
                   compute_dtype=None):
    """x: (B, input_dim); w_i: (in, out); b_i: (1, out). Returns (B, n_actions)."""
    B, in_dim = x.shape
    hid = w1.shape[1]
    n_actions = w3.shape[1]
    out_dtype = x.dtype

    # ---- optional low-precision matmul operands (f32 accumulation) --------
    if compute_dtype is not None:
        x = x.astype(compute_dtype)
        w1 = w1.astype(compute_dtype)
        w2 = w2.astype(compute_dtype)
        w3 = w3.astype(compute_dtype)
    # Biases stay f32 so bias add / leaky_relu run in f32 (also OK on v5e).
    b1 = b1.astype(jnp.float32)
    b2 = b2.astype(jnp.float32)
    b3 = b3.astype(jnp.float32)

    # ---- lane-dense intermediates: pad the hidden dim to 128 --------------
    # leaky_relu(0) = 0 and zero rows of w2/w3 make the padding transparent.
    hid_pad = _round_up(hid, LANE)
    if hid_pad != hid:
        dh = hid_pad - hid
        w1 = jnp.pad(w1, ((0, 0), (0, dh)))
        b1 = jnp.pad(b1, ((0, 0), (0, dh)))
        w2 = jnp.pad(w2, ((0, dh), (0, dh)))
        b2 = jnp.pad(b2, ((0, 0), (0, dh)))
        w3 = jnp.pad(w3, ((0, dh), (0, 0)))

    # ---- VMEM budget (lane-padding & generation aware) --------------------
    try:
        vmem_capacity = int(pltpu.get_tpu_info().vmem_capacity_bytes)
    except Exception:
        vmem_capacity = 64 * 1024 * 1024   # conservative (v7x per-TC)

    x_item = jnp.dtype(x.dtype).itemsize
    o_item = jnp.dtype(out_dtype).itemsize
    in_lanes = _round_up(in_dim, LANE)       # VMEM tiles pad the minor dim
    out_lanes = _round_up(n_actions, LANE)   # to 128 lanes regardless of logic
    per_row_bytes = (2 * in_lanes * x_item     # x tile   (double-buffered)
                     + 2 * out_lanes * o_item  # q tile   (double-buffered)
                     + 2 * hid_pad * 4)        # f32 h1/h2 intermediates

    weight_bytes = sum(int(a.size) * jnp.dtype(a.dtype).itemsize
                       for a in (w1, b1, w2, b2, w3, b3))
    # TODO(synk): weights have a constant index_map; pipeline_mode=pl.Buffered(1)
    # would halve their resident footprint when critic_dim grows large.

    # ---- batch tile: alignment follows operand packing ---------------------
    if x_item == 2:
        row_align = 16      # bf16 packs 16 rows / vreg
    elif x_item == 1:
        row_align = 32      # fp8/int8 pack 32 rows / vreg
    else:
        row_align = 8       # f32 sublane width

    min_steps = 4           # >=2 TCs on v7x + pipeline overlap
    if tile_b is None:
        budget = max(vmem_capacity // 2 - 2 * weight_bytes, 1 << 20)
        tile_b = min(budget // per_row_bytes, 8192)
        # Keep at least `min_steps` grid steps when the batch allows it, so
        # the "parallel" axis can shard across v7x's two TensorCores.
        if B >= min_steps * row_align:
            tile_b = min(tile_b, pl.cdiv(B, min_steps))
        tile_b = max(row_align, (tile_b // row_align) * row_align)
    tile_b = min(int(tile_b), _round_up(B, row_align))
    tile_b = max(row_align, _round_up(tile_b, row_align))

    grid = (pl.cdiv(B, tile_b),)

    vmem_need = 2 * weight_bytes + tile_b * per_row_bytes + (2 << 20)
    vmem_limit = int(min(max(32 << 20, 2 * vmem_need),
                         vmem_capacity - (8 << 20)))
    vmem_limit = max(vmem_limit, vmem_need)

    flops = 2 * B * (in_dim * hid_pad + hid_pad * hid_pad + hid_pad * n_actions)
    bytes_accessed = (B * in_dim * x_item + weight_bytes
                      + B * n_actions * o_item)
    cost = pl.CostEstimate(flops=flops, transcendentals=0,
                           bytes_accessed=bytes_accessed)

    # Weights/biases: constant index_map -> fetched once, resident in VMEM.
    resident = lambda shape: pl.BlockSpec(shape, lambda i: (0, 0))

    q = pl.pallas_call(
        central_critic_kernel,
        out_shape=jax.ShapeDtypeStruct((B, n_actions), out_dtype),
        grid_spec=pltpu.PrefetchScalarGridSpec(
            num_scalar_prefetch=0,
            grid=grid,
            in_specs=[
                pl.BlockSpec((tile_b, in_dim), lambda i: (i, 0)),   # x tile
                resident(w1.shape), resident(b1.shape),
                resident(w2.shape), resident(b2.shape),
                resident(w3.shape), resident(b3.shape),
            ],
            # Narrow output (last dim == full array dim): no 16x zero-padding
            # writeback and no wrapper slice pass.
            out_specs=pl.BlockSpec((tile_b, n_actions), lambda i: (i, 0)),
        ),
        compiler_params=pltpu.CompilerParams(
            dimension_semantics=("parallel",),
            vmem_limit_bytes=vmem_limit),
        cost_estimate=cost,
    )(x, w1, b1, w2, b2, w3, b3)

    return q


def init_params(key, input_shape, critic_dim, n_actions, dtype=jnp.float32):
    """Deterministic synthetic init (uniform, PyTorch-Linear-like fan-in bound)."""
    ks = jax.random.split(key, 6)

    def linear(kw, kb, fan_in, fan_out):
        bound = 1.0 / jnp.sqrt(fan_in)
        # stored as (in, out) so kernel does x @ W
        w = jax.random.uniform(kw, (fan_in, fan_out), dtype, -bound, bound)
        b = jax.random.uniform(kb, (1, fan_out), dtype, -bound, bound)
        return w, b

    w1, b1 = linear(ks[0], ks[1], input_shape, critic_dim)
    w2, b2 = linear(ks[2], ks[3], critic_dim, critic_dim)
    w3, b3 = linear(ks[4], ks[5], critic_dim, n_actions)
    return w1, b1, w2, b2, w3, b3


def reference(x, w1, b1, w2, b2, w3, b3):
    h1 = jax.nn.leaky_relu(x @ w1 + b1, NEG_SLOPE)
    h2 = jax.nn.leaky_relu(h1 @ w2 + b2, NEG_SLOPE)
    return h2 @ w3 + b3


if __name__ == "__main__":
    key = jax.random.PRNGKey(0)

    def run_case(batch, input_shape, critic_dim, n_actions, *, tile_b=None,
                 compute_dtype=None, atol=1e-5, rtol=1e-5):
        kx, kp = jax.random.split(jax.random.fold_in(key, batch))
        x = jax.random.normal(kx, (batch, input_shape), jnp.float32)
        params = init_params(kp, input_shape, critic_dim, n_actions)
        q = central_critic(x, *params, tile_b=tile_b,
                           compute_dtype=compute_dtype)
        q = jax.block_until_ready(q)
        q_ref = reference(x, *params)
        assert q.shape == (batch, n_actions), q.shape
        err = jnp.max(jnp.abs(q - q_ref))
        assert jnp.allclose(q, q_ref, atol=atol, rtol=rtol), (
            f"mismatch vs reference (max abs err {err:.3e})")

    # f32, module-consistent small shapes (single-tile grid).
    run_case(8, 32, 64, 8)
    # Multi-step grid with a ragged tail (Pallas masks the tail output write).
    run_case(20, 32, 64, 8, tile_b=8)
    # Auto tile derivation: >=4 grid steps for megacore sharding.
    run_case(256, 32, 64, 8)
    # bf16 matmul operands, f32 accumulation, multi-step pipelined grid.
    run_case(256, 32, 64, 8, tile_b=64, compute_dtype=jnp.bfloat16,
             atol=5e-2, rtol=5e-2)

    print("KERNEL_OK")
</pallas_src>

<mosaic_0001>
module attributes {stable_mosaic.version = 11 : i64} {
  func.func @central_critic_kernel(%arg0: i32, %arg1: memref<8x32xf32, #tpu.memory_space<vmem>>, %arg2: memref<32x128xf32, #tpu.memory_space<vmem>>, %arg3: memref<1x128xf32, #tpu.memory_space<vmem>>, %arg4: memref<128x128xf32, #tpu.memory_space<vmem>>, %arg5: memref<1x128xf32, #tpu.memory_space<vmem>>, %arg6: memref<128x8xf32, #tpu.memory_space<vmem>>, %arg7: memref<1x8xf32, #tpu.memory_space<vmem>>, %arg8: memref<8x8xf32, #tpu.memory_space<vmem>>) attributes {dimension_semantics = [#tpu.dimension_semantics<parallel>], iteration_bounds = array<i64: 1>, scalar_prefetch = 0 : i64, scratch_operands = 0 : i64, tpu.core_type = #tpu.core_type<tc>, window_params = [{transform_indices = @transform_0, window_bounds = array<i64: 8, 32>}, {pipeline_mode = #tpu.pipeline_mode<synchronous>, transform_indices = @transform_1, window_bounds = array<i64: 32, 128>}, {pipeline_mode = #tpu.pipeline_mode<synchronous>, transform_indices = @transform_2, window_bounds = array<i64: 1, 128>}, {pipeline_mode = #tpu.pipeline_mode<synchronous>, transform_indices = @transform_3, window_bounds = array<i64: 128, 128>}, {pipeline_mode = #tpu.pipeline_mode<synchronous>, transform_indices = @transform_4, window_bounds = array<i64: 1, 128>}, {pipeline_mode = #tpu.pipeline_mode<synchronous>, transform_indices = @transform_5, window_bounds = array<i64: 128, 8>}, {pipeline_mode = #tpu.pipeline_mode<synchronous>, transform_indices = @transform_6, window_bounds = array<i64: 1, 8>}, {transform_indices = @transform_7, window_bounds = array<i64: 8, 8>}]} {
    %c0 = arith.constant 0 : index
    %c0_0 = arith.constant 0 : index
    %0 = vector.load %arg1[%c0, %c0_0] : memref<8x32xf32, #tpu.memory_space<vmem>>, vector<8x32xf32>
    %c0_1 = arith.constant 0 : index
    %c0_2 = arith.constant 0 : index
    %1 = vector.load %arg2[%c0_1, %c0_2] : memref<32x128xf32, #tpu.memory_space<vmem>>, vector<32x128xf32>
    %cst = arith.constant dense<0.000000e+00> : vector<8x128xf32>
    %2 = tpu.matmul %0, %1, %cst {dimension_numbers = #tpu.dot_dimension_numbers<[1], [0], [0], [1], [0, 0, 1, 1], [], []>} : vector<8x32xf32>, vector<32x128xf32>, vector<8x128xf32> -> vector<8x128xf32>
    %c0_3 = arith.constant 0 : index
    %c0_4 = arith.constant 0 : index
    %3 = vector.load %arg3[%c0_3, %c0_4] : memref<1x128xf32, #tpu.memory_space<vmem>>, vector<1x128xf32>
    %4 = vector.broadcast %3 : vector<1x128xf32> to vector<8x128xf32>
    %5 = arith.addf %2, %4 : vector<8x128xf32>
    %cst_5 = arith.constant 0.00999999977 : f32
    %6 = vector.broadcast %cst_5 : f32 to vector<8x128xf32>
    %7 = arith.mulf %6, %5 : vector<8x128xf32>
    %8 = arith.maximumf %5, %7 : vector<8x128xf32>
    %c0_6 = arith.constant 0 : index
    %c0_7 = arith.constant 0 : index
    %9 = vector.load %arg4[%c0_6, %c0_7] : memref<128x128xf32, #tpu.memory_space<vmem>>, vector<128x128xf32>
    %cst_8 = arith.constant dense<0.000000e+00> : vector<8x128xf32>
    %10 = tpu.matmul %8, %9, %cst_8 {dimension_numbers = #tpu.dot_dimension_numbers<[1], [0], [0], [1], [0, 0, 1, 1], [], []>} : vector<8x128xf32>, vector<128x128xf32>, vector<8x128xf32> -> vector<8x128xf32>
    %c0_9 = arith.constant 0 : index
    %c0_10 = arith.constant 0 : index
    %11 = vector.load %arg5[%c0_9, %c0_10] : memref<1x128xf32, #tpu.memory_space<vmem>>, vector<1x128xf32>
    %12 = vector.broadcast %11 : vector<1x128xf32> to vector<8x128xf32>
    %13 = arith.addf %10, %12 : vector<8x128xf32>
    %cst_11 = arith.constant 0.00999999977 : f32
    %14 = vector.broadcast %cst_11 : f32 to vector<8x128xf32>
    %15 = arith.mulf %14, %13 : vector<8x128xf32>
    %16 = arith.maximumf %13, %15 : vector<8x128xf32>
    %c0_12 = arith.constant 0 : index
    %c0_13 = arith.constant 0 : index
    %17 = vector.load %arg6[%c0_12, %c0_13] : memref<128x8xf32, #tpu.memory_space<vmem>>, vector<128x8xf32>
    %cst_14 = arith.constant dense<0.000000e+00> : vector<8x8xf32>
    %18 = tpu.matmul %16, %17, %cst_14 {dimension_numbers = #tpu.dot_dimension_numbers<[1], [0], [0], [1], [0, 0, 1, 1], [], []>} : vector<8x128xf32>, vector<128x8xf32>, vector<8x8xf32> -> vector<8x8xf32>
    %c0_15 = arith.constant 0 : index
    %c0_16 = arith.constant 0 : index
    %19 = vector.load %arg7[%c0_15, %c0_16] : memref<1x8xf32, #tpu.memory_space<vmem>>, vector<1x8xf32>
    %20 = vector.broadcast %19 : vector<1x8xf32> to vector<8x8xf32>
    %21 = arith.addf %18, %20 : vector<8x8xf32>
    %c0_17 = arith.constant 0 : index
    %c0_18 = arith.constant 0 : index
    %22 = vector.load %arg8[%c0_17, %c0_18] : memref<8x8xf32, #tpu.memory_space<vmem>>, vector<8x8xf32>
    tpu.vector_store %arg8[%c0_17, %c0_18], %21 {strides = array<i32>} : memref<8x8xf32, #tpu.memory_space<vmem>>, vector<8x8xf32>,
    return
  }
  func.func @transform_0(%arg0: i32) -> (i32, i32) {
    %c0_i32 = arith.constant 0 : i32
    %c0_i32_0 = arith.constant 0 : i32
    return %arg0, %c0_i32 : i32, i32
  }
  func.func @transform_1(%arg0: i32) -> (i32, i32) {
    %c0_i32 = arith.constant 0 : i32
    %c0_i32_0 = arith.constant 0 : i32
    %c0_i32_1 = arith.constant 0 : i32
    return %c0_i32, %c0_i32_0 : i32, i32
  }
  func.func @transform_2(%arg0: i32) -> (i32, i32) {
    %c0_i32 = arith.constant 0 : i32
    %c0_i32_0 = arith.constant 0 : i32
    %c0_i32_1 = arith.constant 0 : i32
    return %c0_i32, %c0_i32_0 : i32, i32
  }
  func.func @transform_3(%arg0: i32) -> (i32, i32) {
    %c0_i32 = arith.constant 0 : i32
    %c0_i32_0 = arith.constant 0 : i32
    %c0_i32_1 = arith.constant 0 : i32
    return %c0_i32, %c0_i32_0 : i32, i32
  }
  func.func @transform_4(%arg0: i32) -> (i32, i32) {
    %c0_i32 = arith.constant 0 : i32
    %c0_i32_0 = arith.constant 0 : i32
    %c0_i32_1 = arith.constant 0 : i32
    return %c0_i32, %c0_i32_0 : i32, i32
  }
  func.func @transform_5(%arg0: i32) -> (i32, i32) {
    %c0_i32 = arith.constant 0 : i32
    %c0_i32_0 = arith.constant 0 : i32
    %c0_i32_1 = arith.constant 0 : i32
    return %c0_i32, %c0_i32_0 : i32, i32
  }
  func.func @transform_6(%arg0: i32) -> (i32, i32) {
    %c0_i32 = arith.constant 0 : i32
    %c0_i32_0 = arith.constant 0 : i32
    %c0_i32_1 = arith.constant 0 : i32
    return %c0_i32, %c0_i32_0 : i32, i32
  }
  func.func @transform_7(%arg0: i32) -> (i32, i32) {
    %c0_i32 = arith.constant 0 : i32
    %c0_i32_0 = arith.constant 0 : i32
    return %arg0, %c0_i32 : i32, i32
  }
}

</mosaic_0001>

<bundles_post_ra>
// kernel: tpu_custom_call.1
= control target key start
LH: loop header
LB: loop body
LE: loop exit
PB: predicated region body
PF: predicated region fallthrough
CT: control target
= control target key end

     0   :  { %12 = vsyncpa [#allocation3], 0  ;;  %s397_s0 = inlined_call_operand.vmem [shape: f32[8,32], index: 0, kind: input, shape index: {}]   ;;  %s398_s1 = inlined_call_operand.hbm [shape: f32[32,128], index: 1, kind: input, shape index: {}]   ;;  %s399_s2 = inlined_call_operand.vmem [shape: f32[1,128], index: 2, kind: input, shape index: {}]   ;;  %s400_s3 = inlined_call_operand.vmem [shape: f32[128,128], index: 3, kind: input, shape index: {}]   ;;  %s401_s4 = inlined_call_operand.vmem [shape: f32[1,128], index: 4, kind: input, shape index: {}]   ;;  %s402_s5 = inlined_call_operand.vmem [shape: f32[128,8], index: 5, kind: input, shape index: {}]   ;;  %s403_s6 = inlined_call_operand.vmem [shape: f32[1,8], index: 6, kind: input, shape index: {}]   ;;  %s404_s7 = inlined_call_operand.hbm [shape: f32[8,8], index: 7, kind: output, shape index: {}]  }
   0x1   :  { %13 = vsyncpa [#allocation4], 0  ;;  %s20_s26 = sshll.u32 %s398_s1, 4  ;;  %s239_s27 = smov [#allocation2]   ;;  %s21_s26 = int_to_ptr.hbm [resolvable:$true] %s20_s26 }
   0x2   :  { %s22_s28 = sshll.u32 %s239_s27, 4  ;;  %s240_s29 = smov 128   ;;  %s23_s28 = int_to_ptr.vmem [resolvable:$true] %s22_s28 }
   0x3   :  { %s241_s30 = smov 8  }
   0x4   :  { %28 = dma.hbm_to_vmem [thread:$0]  %s21_s26, 512, %s23_s28, [#allocation3], %s240_s29, %s240_s29, %s241_s30  }
   0x5   :  { %235 = dma.done.wait [#allocation3], 512  }
   0x6   :  { %236 = vsyncadd [#allocation3], 4294966784  ;;  %v47_v0 = vld [vmem:[#allocation2 + $0x18] sm:$0xff]  ;;  %v46_v1 = vld [vmem:[#allocation2 + $0x10] sm:$0xff]  ;;  %vm52_vm0 = vcmask 261120   ;;  %s242_s25 = smov [#allocation5]  }
   0x7   :  { %68 = vmatpush.msra.mxu0 %v47_v0  ;;  %v93_v2 = vld [vmem:[%s400_s3 + $0x78] sm:$0xff]  ;;  %v45_v3 = vld [vmem:[#allocation2 + $0x8] sm:$0xff]  ;;  %v92_v4 = vld [vmem:[%s400_s3 + $0x70] sm:$0xff]  ;;  %s167_s26 = sshll.u32 %s242_s25, 4  ;;  %vm160_vm1 = vcmask 64512   ;;  %s168_s26 = int_to_ptr.vmem [resolvable:$true] %s167_s26 }
   0x8   :  { %98 = vmatpush.msra.mxu1 %v93_v2  ;;  %v91_v5 = vld [vmem:[%s400_s3 + $0x68] sm:$0xff]  ;;  %v44_v6 = vld [vmem:[#allocation2] sm:$0xff]  ;;  %v89_v9 = vld [vmem:[%s400_s3 + $0x58] sm:$0xff] }
   0x9   :  { %69 = vmatpush.msra.mxu0 %v46_v1  ;;  %v43_v7 = vld [vmem:[%s397_s0] sm:$0xff]  ;;  %v88_v10 = vld [vmem:[%s400_s3 + $0x50] sm:$0xff]  ;;  %v87_v11 = vld [vmem:[%s400_s3 + $0x48] sm:$0xff] }
   0xa   :  { %99 = vmatpush.msra.mxu1 %v92_v4  ;;  %v90_v8 = vld [vmem:[%s400_s3 + $0x60] sm:$0xff]  ;;  %v85_v13 = vld [vmem:[%s400_s3 + $0x38] sm:$0xff]  ;;  %v84_v14 = vld [vmem:[%s400_s3 + $0x30] sm:$0xff] }
   0xb   :  { %70 = vmatpush.msra.mxu0 %v45_v3  ;;  %v86_v12 = vld [vmem:[%s400_s3 + $0x40] sm:$0xff]  ;;  %v83_v15 = vld [vmem:[%s400_s3 + $0x28] sm:$0xff]  ;;  %v81_v17 = vld [vmem:[%s400_s3 + $0x18] sm:$0xff] }
   0xc   :  { %100 = vmatpush.msra.mxu1 %v91_v5  ;;  %v82_v16 = vld [vmem:[%s400_s3 + $0x20] sm:$0xff]  ;;  %v80_v18 = vld [vmem:[%s400_s3 + $0x10] sm:$0xff]  ;;  %v79_v19 = vld [vmem:[%s400_s3 + $0x8] sm:$0xff] }
   0xd   :  { %71 = vmatpush.msra.mxu0 %v44_v6  ;;  %v78_v20 = vld [vmem:[%s400_s3] sm:$0xff]  ;;  %v135_v21 = vld [vmem:[%s402_s5 + $0x78] sm:$0xff]  ;;  %v134_v22 = vld [vmem:[%s402_s5 + $0x70] sm:$0xff] }
   0xe   :  { %179 = vmatmul.msk.f32.vlgmr.msra.gmra.mxu0 %vm52_vm0, %v43_v7  ;;  %101 = vmatpush.msra.mxu1 %v90_v8  ;;  %v133_v23 = vld [vmem:[%s402_s5 + $0x68] sm:$0xff]  ;;  %v132_v24 = vld [vmem:[%s402_s5 + $0x60] sm:$0xff]  ;;  %v131_v25 = vld [vmem:[%s402_s5 + $0x58] sm:$0xff] }
   0xf   :  { %140 = vmatpush.msra.mxu2 %v135_v21  ;;  %v130_v26 = vld [vmem:[%s402_s5 + $0x50] sm:$0xff]  ;;  %v129_v27 = vld [vmem:[%s402_s5 + $0x48] sm:$0xff]  ;;  %v128_v28 = vld [vmem:[%s402_s5 + $0x40] sm:$0xff] }
  0x10   :  { %102 = vmatpush.msra.mxu1 %v89_v9  ;;  %v127_v29 = vld [vmem:[%s402_s5 + $0x38] sm:$0xff]  ;;  %v126_v30 = vld [vmem:[%s402_s5 + $0x30] sm:$0xff]  ;;  %v125_v31 = vld [vmem:[%s402_s5 + $0x28] sm:$0xff] }
  0x11   :  { %141 = vmatpush.msra.mxu2 %v134_v22  ;;  %v124_v32 = vld [vmem:[%s402_s5 + $0x20] sm:$0xff]  ;;  %v123_v38 = vld [vmem:[%s402_s5 + $0x18] sm:$0xff]  ;;  %v122_v39 = vld [vmem:[%s402_s5 + $0x10] sm:$0xff] }
  0x12   :  { %103 = vmatpush.msra.mxu1 %v88_v10  ;;  %v184_v33 = vld [vmem:[%s399_s2] ss:$0 sm:$0xff]  ;;  %v121_v40 = vld [vmem:[%s402_s5 + $0x8] sm:$0xff] }
  0x13   :  { %142 = vmatpush.msra.mxu2 %v133_v23  ;;  %v120_v41 = vld [vmem:[%s402_s5] sm:$0xff]  ;;  %s169_s5 = sshll.u32 %s404_s7, 4  ;;  %s170_s5 = int_to_ptr.hbm [resolvable:$true] %s169_s5 }
  0x14   :  { %104 = vmatpush.msra.mxu1 %v87_v11  ;;  %v185_v42 = vld [vmem:[%s401_s4] ss:$0 sm:$0xff] }
  0x15   :  { %143 = vmatpush.msra.mxu2 %v132_v24  ;;  %v186_v47 = vld [vmem:[%s403_s6] ss:$0 sm:$0xff] }
  0x16   :  { %105 = vmatpush.msra.mxu1 %v86_v12 }
  0x17   :  { %144 = vmatpush.msra.mxu2 %v131_v25 }
  0x18   :  { %106 = vmatpush.msra.mxu1 %v85_v13 }
  0x19   :  { %145 = vmatpush.msra.mxu2 %v130_v26 }
  0x1a   :  { %107 = vmatpush.msra.mxu1 %v84_v14 }
  0x1b   :  { %146 = vmatpush.msra.mxu2 %v129_v27 }
  0x1c   :  { %108 = vmatpush.msra.mxu1 %v83_v15 }
  0x1d   :  { %147 = vmatpush.msra.mxu2 %v128_v28 }
  0x1e   :  { %109 = vmatpush.msra.mxu1 %v82_v16 }
  0x1f   :  { %148 = vmatpush.msra.mxu2 %v127_v29 }
  0x20   :  { %110 = vmatpush.msra.mxu1 %v81_v17 }
  0x21   :  { %149 = vmatpush.msra.mxu2 %v126_v30 }
  0x22   :  { %111 = vmatpush.msra.mxu1 %v80_v18 }
  0x23   :  { %150 = vmatpush.msra.mxu2 %v125_v31 }
  0x24   :  { %112 = vmatpush.msra.mxu1 %v79_v19 }
  0x25   :  { %151 = vmatpush.msra.mxu2 %v124_v32 }
  0x26   :  { %113 = vmatpush.msra.mxu1 %v78_v20 }
  0x27   :  { %152 = vmatpush.msra.mxu2 %v123_v38 }
  0x29   :  { %153 = vmatpush.msra.mxu2 %v122_v39 }
  0x2b   :  { %154 = vmatpush.msra.mxu2 %v121_v40 }
  0x2d   :  { %155 = vmatpush.msra.mxu2 %v120_v41 }
  0x8b   :  { %v73_v34 = vpop.f32.mrf.mxu0 }
  0x8c   :  { %v74_v35 = vadd.f32 %v184_v33, %v73_v34 }
  0x8e   :  { %v76_v36 = vmul.f32 0.01, %v74_v35 }
  0x90   :  { %v77_v37 = vmax.f32 %v74_v35, %v76_v36 }
  0x92   :  { %114 = vmatmul.f32.vlgmr.msra.gmra.mxu1 %v77_v37 }
 0x10f   :  { %v115_v43 = vpop.f32.mrf.mxu1 }
 0x110   :  { %v116_v44 = vadd.f32 %v185_v42, %v115_v43 }
 0x112   :  { %v118_v45 = vmul.f32 0.01, %v116_v44 }
 0x114   :  { %v119_v46 = vmax.f32 %v116_v44, %v118_v45 }
 0x116   :  { %156 = vmatmul.f32.vlgmr.msra.gmra.mxu2 %v119_v46 }
 0x199   :  { %v157_v48 = vpop.f32.mrf.mxu2 }
 0x19a   :  { %v158_v49 = vadd.f32 %v186_v47, %v157_v48 }
 0x19c   :  { %161 = vst.msk [vmem:[#allocation5] sm:$0xff] %vm160_vm1, %v158_v49 }
 0x19d   :  { %172 = dma.vmem_to_hbm [thread:$0]  %s168_s26, 128, %s170_s5, [#allocation4]  }
 0x19e   :  { %237 = dma.done.wait [#allocation4], 128  }
 0x19f   :  { %238 = vsyncadd [#allocation4], 4294967168 }
 0x1a0   :  { %177 = vsyncpa [#allocation3], 1 }
 0x1a1   :  { %178 = vsyncpa [#allocation4], 1 }

</bundles_post_ra>
